<compile_context>
chip_gen: v6e
topology: v6e:2x2x1
jax: 0.10.0
libtpu: 0.0.40
codegen_flags: <defaults>
</compile_context>

<pallas_src>
import math

import jax
import jax.numpy as jnp
from jax.experimental import pallas as pl
from jax.experimental.pallas import tpu as pltpu

# ---- problem sizes (small, consistent with the module) ----------------------
BATCH = 2
SEQ = 8
DIM = 32
HEADS = 4
HEAD_DIM = DIM // HEADS
FF_HIDDEN = 128
EPS = 1e-5


def transformer_block_kernel(
    x_ref,                 # (B*S, D)  all tokens, batch folded into rows
    mask_ref,              # (B*S, B*S) additive block-diagonal mask (0 / -1e30)
    wqkv_ref, bqkv_ref,    # (D, 3D), (1, 3D)  fused QKV (Q part pre-scaled by 1/sqrt(Hd))
    wo_ref, bo_ref,        # (D, D), (1, D)
    g1_ref, beta1_ref,     # (1, D)  LayerNorm1 scale / shift
    w1_ref, bf1_ref,       # (D, FF), (1, FF)
    w2_ref, bf2_ref,       # (FF, D), (1, D)
    g2_ref, beta2_ref,     # (1, D)  LayerNorm2 scale / shift
    out_ref,               # (B*S, D)
):
    x = x_ref[...]                                             # (T, D) f32
    mask = mask_ref[...]                                       # (T, T)

    # ---- fused QKV projection: one MXU push with N = 3D ----------------------
    qkv = jnp.dot(x, wqkv_ref[...], preferred_element_type=jnp.float32) + bqkv_ref[...]

    wo = wo_ref[...]                                           # (D, D) loaded once

    # ---- per-head attention, accumulated straight through W_o ---------------
    # scale already folded into the Q columns of wqkv/bqkv.
    attn = None
    for h in range(HEADS):                                     # static unrolled head loop
        lo = h * HEAD_DIM
        qh = qkv[:, lo:lo + HEAD_DIM]                          # (T, Hd)
        kh = qkv[:, DIM + lo:DIM + lo + HEAD_DIM]              # (T, Hd)
        vh = qkv[:, 2 * DIM + lo:2 * DIM + lo + HEAD_DIM]      # (T, Hd)

        # NT contraction, no explicit transpose: s[q, k] = sum_d qh[q,d] * kh[k,d]
        s = jnp.einsum("qd,kd->qk", qh, kh,
                       preferred_element_type=jnp.float32)     # (T, T)
        s = s + mask                                           # block out cross-batch keys
        s = s - jnp.max(s, axis=-1, keepdims=True)
        p = jnp.exp(s)
        denom = jnp.sum(p, axis=-1, keepdims=True)
        p = p * pl.reciprocal(denom, approx=True)              # EUP instead of VALU divide

        oh = jnp.dot(p, vh, preferred_element_type=jnp.float32)            # (T, Hd)
        contrib = jnp.dot(oh, wo[lo:lo + HEAD_DIM, :],
                          preferred_element_type=jnp.float32)               # (T, D)
        attn = contrib if attn is None else attn + contrib
    attn = attn + bo_ref[...]

    # dropout == identity (eval mode)

    # ---- residual + LayerNorm1 -----------------------------------------------
    h1 = x + attn
    mu1 = jnp.mean(h1, axis=-1, keepdims=True)
    c1 = h1 - mu1
    var1 = jnp.mean(c1 * c1, axis=-1, keepdims=True)
    x1 = c1 * jax.lax.rsqrt(var1 + EPS) * g1_ref[...] + beta1_ref[...]

    # ---- feed-forward: Linear -> ReLU -> Linear ------------------------------
    ff = jnp.dot(x1, w1_ref[...], preferred_element_type=jnp.float32) + bf1_ref[...]
    ff = jnp.maximum(ff, 0.0)
    ff = jnp.dot(ff, w2_ref[...], preferred_element_type=jnp.float32) + bf2_ref[...]

    # ---- residual + LayerNorm2 -----------------------------------------------
    h2 = x1 + ff
    mu2 = jnp.mean(h2, axis=-1, keepdims=True)
    c2 = h2 - mu2
    var2 = jnp.mean(c2 * c2, axis=-1, keepdims=True)
    out = c2 * jax.lax.rsqrt(var2 + EPS) * g2_ref[...] + beta2_ref[...]

    out_ref[...] = out.astype(out_ref.dtype)


@jax.jit
def transformer_block(x, kernel_params):
    """x: (B, S, D) float32; kernel_params: list of 2-D pre-packed parameter arrays."""
    B, S, D = x.shape
    T = B * S
    x2d = x.reshape(T, D)                                       # contiguous, free in XLA

    # Block-diagonal additive mask: token i attends to token j only within its own batch
    # element.  Depends only on static shapes -> constant-folded at trace time.
    batch_id = jnp.arange(T, dtype=jnp.int32) // S
    mask = jnp.where(batch_id[:, None] == batch_id[None, :],
                     jnp.float32(0.0), jnp.float32(-1e30))      # (T, T)

    n_inputs = 2 + len(kernel_params)                           # x, mask, params
    vmem_specs = [pl.BlockSpec(memory_space=pltpu.MemorySpace.VMEM) for _ in range(n_inputs)]

    out2d = pl.pallas_call(
        transformer_block_kernel,
        out_shape=jax.ShapeDtypeStruct((T, D), x.dtype),
        in_specs=vmem_specs,
        out_specs=pl.BlockSpec(memory_space=pltpu.MemorySpace.VMEM),
    )(x2d, mask, *kernel_params)

    return out2d.reshape(B, S, D)


# ---- parameter packing (PyTorch layout -> kernel layout), done once ----------
def prepare_kernel_params(raw):
    (in_w, in_b, out_w, out_b, g1, be1, w1, b1, w2, b2, g2, be2) = raw
    D = DIM
    scale = 1.0 / math.sqrt(HEAD_DIM)
    # Linear weights pre-transposed to (in, out); attention scale folded into Q weights/bias.
    wq = in_w[0 * D:1 * D].T * scale
    wk = in_w[1 * D:2 * D].T
    wv = in_w[2 * D:3 * D].T
    wqkv = jnp.concatenate([wq, wk, wv], axis=1)                         # (D, 3D)
    bqkv = jnp.concatenate(
        [in_b[0 * D:1 * D] * scale, in_b[1 * D:2 * D], in_b[2 * D:3 * D]])[None, :]  # (1, 3D)
    return [
        wqkv, bqkv,
        out_w.T, out_b[None, :],
        g1[None, :], be1[None, :],
        w1.T, b1[None, :],
        w2.T, b2[None, :],
        g2[None, :], be2[None, :],
    ]


# ---- pure-JAX reference (mirrors PyTorch eval-mode forward, raw torch layout) ----
def reference_forward(x, raw):
    (in_w, in_b, out_w, out_b, g1, be1, w1, b1, w2, b2, g2, be2) = raw
    B, S, D = x.shape

    def ln(h, g, b):
        mu = jnp.mean(h, axis=-1, keepdims=True)
        var = jnp.mean((h - mu) ** 2, axis=-1, keepdims=True)
        return (h - mu) * jax.lax.rsqrt(var + EPS) * g + b

    q = x @ in_w[0 * D:1 * D].T + in_b[0 * D:1 * D]
    k = x @ in_w[1 * D:2 * D].T + in_b[1 * D:2 * D]
    v = x @ in_w[2 * D:3 * D].T + in_b[2 * D:3 * D]
    qh = q.reshape(B, S, HEADS, HEAD_DIM).transpose(0, 2, 1, 3)
    kh = k.reshape(B, S, HEADS, HEAD_DIM).transpose(0, 2, 1, 3)
    vh = v.reshape(B, S, HEADS, HEAD_DIM).transpose(0, 2, 1, 3)
    s = jnp.einsum("bhqd,bhkd->bhqk", qh, kh) / math.sqrt(HEAD_DIM)
    p = jax.nn.softmax(s, axis=-1)
    attn = jnp.einsum("bhqk,bhkd->bhqd", p, vh).transpose(0, 2, 1, 3).reshape(B, S, D)
    attn = attn @ out_w.T + out_b
    x1 = ln(x + attn, g1, be1)
    ff = jnp.maximum(x1 @ w1.T + b1, 0.0) @ w2.T + b2
    return ln(x1 + ff, g2, be2)


if __name__ == "__main__":
    key = jax.random.PRNGKey(0)
    ks = jax.random.split(key, 10)

    x = jax.random.normal(ks[0], (BATCH, SEQ, DIM), jnp.float32)

    # PyTorch-shaped parameters, deterministically initialized.
    in_proj_w = jax.random.normal(ks[1], (3 * DIM, DIM), jnp.float32) * 0.05   # (3D, D)
    in_proj_b = jax.random.normal(ks[2], (3 * DIM,), jnp.float32) * 0.05
    out_proj_w = jax.random.normal(ks[3], (DIM, DIM), jnp.float32) * 0.05
    out_proj_b = jax.random.normal(ks[4], (DIM,), jnp.float32) * 0.05
    ff_w1 = jax.random.normal(ks[5], (FF_HIDDEN, DIM), jnp.float32) * 0.05     # (out, in)
    ff_b1 = jax.random.normal(ks[6], (FF_HIDDEN,), jnp.float32) * 0.05
    ff_w2 = jax.random.normal(ks[7], (DIM, FF_HIDDEN), jnp.float32) * 0.05
    ff_b2 = jax.random.normal(ks[8], (DIM,), jnp.float32) * 0.05
    ln1_g, ln1_b = jnp.ones((DIM,), jnp.float32), jnp.zeros((DIM,), jnp.float32)
    ln2_g, ln2_b = jnp.ones((DIM,), jnp.float32), jnp.zeros((DIM,), jnp.float32)

    raw_params = (in_proj_w, in_proj_b, out_proj_w, out_proj_b,
                  ln1_g, ln1_b, ff_w1, ff_b1, ff_w2, ff_b2, ln2_g, ln2_b)

    kernel_params = prepare_kernel_params(raw_params)

    out = transformer_block(x, kernel_params)
    out = jax.block_until_ready(out)

    ref = reference_forward(x, raw_params)
    assert out.shape == (BATCH, SEQ, DIM)
    max_err = float(jnp.max(jnp.abs(out - ref)))
    # Tolerance relaxed slightly vs exact-divide version because the softmax denominator
    # uses the approximate EUP reciprocal.
    assert jnp.allclose(out, ref, atol=2e-3, rtol=2e-3), (
        f"Pallas output mismatch vs reference (max abs err {max_err})")

    print("KERNEL_OK")
</pallas_src>

<mosaic_0001>
module attributes {stable_mosaic.version = 11 : i64} {
  func.func @transformer_block_kernel(%arg0: memref<16x32xf32, #tpu.memory_space<vmem>>, %arg1: memref<16x16xf32, #tpu.memory_space<vmem>>, %arg2: memref<32x96xf32, #tpu.memory_space<vmem>>, %arg3: memref<1x96xf32, #tpu.memory_space<vmem>>, %arg4: memref<32x32xf32, #tpu.memory_space<vmem>>, %arg5: memref<1x32xf32, #tpu.memory_space<vmem>>, %arg6: memref<1x32xf32, #tpu.memory_space<vmem>>, %arg7: memref<1x32xf32, #tpu.memory_space<vmem>>, %arg8: memref<32x128xf32, #tpu.memory_space<vmem>>, %arg9: memref<1x128xf32, #tpu.memory_space<vmem>>, %arg10: memref<128x32xf32, #tpu.memory_space<vmem>>, %arg11: memref<1x32xf32, #tpu.memory_space<vmem>>, %arg12: memref<1x32xf32, #tpu.memory_space<vmem>>, %arg13: memref<1x32xf32, #tpu.memory_space<vmem>>, %arg14: memref<16x32xf32, #tpu.memory_space<vmem>>) attributes {dimension_semantics = [], scalar_prefetch = 0 : i64, scratch_operands = 0 : i64, tpu.core_type = #tpu.core_type<tc>} {
    %c0 = arith.constant 0 : index
    %c0_0 = arith.constant 0 : index
    %0 = vector.load %arg0[%c0, %c0_0] : memref<16x32xf32, #tpu.memory_space<vmem>>, vector<16x32xf32>
    %c0_1 = arith.constant 0 : index
    %c0_2 = arith.constant 0 : index
    %1 = vector.load %arg1[%c0_1, %c0_2] : memref<16x16xf32, #tpu.memory_space<vmem>>, vector<16x16xf32>
    %c0_3 = arith.constant 0 : index
    %c0_4 = arith.constant 0 : index
    %2 = vector.load %arg2[%c0_3, %c0_4] : memref<32x96xf32, #tpu.memory_space<vmem>>, vector<32x96xf32>
    %cst = arith.constant dense<0.000000e+00> : vector<16x96xf32>
    %3 = tpu.matmul %0, %2, %cst {dimension_numbers = #tpu.dot_dimension_numbers<[1], [0], [0], [1], [0, 0, 1, 1], [], []>} : vector<16x32xf32>, vector<32x96xf32>, vector<16x96xf32> -> vector<16x96xf32>
    %c0_5 = arith.constant 0 : index
    %c0_6 = arith.constant 0 : index
    %4 = vector.load %arg3[%c0_5, %c0_6] : memref<1x96xf32, #tpu.memory_space<vmem>>, vector<1x96xf32>
    %5 = vector.broadcast %4 : vector<1x96xf32> to vector<16x96xf32>
    %6 = arith.addf %3, %5 : vector<16x96xf32>
    %c0_7 = arith.constant 0 : index
    %c0_8 = arith.constant 0 : index
    %7 = vector.load %arg4[%c0_7, %c0_8] : memref<32x32xf32, #tpu.memory_space<vmem>>, vector<32x32xf32>
    %8 = vector.extract_strided_slice %6 {offsets = [0, 0], sizes = [16, 8], strides = [1, 1]} : vector<16x96xf32> to vector<16x8xf32>
    %9 = vector.extract_strided_slice %6 {offsets = [0, 32], sizes = [16, 8], strides = [1, 1]} : vector<16x96xf32> to vector<16x8xf32>
    %10 = vector.extract_strided_slice %6 {offsets = [0, 64], sizes = [16, 8], strides = [1, 1]} : vector<16x96xf32> to vector<16x8xf32>
    "tpu.trace_start"() <{level = 10 : i32, message = "qd,kd->qk"}> : () -> ()
    %cst_9 = arith.constant dense<0.000000e+00> : vector<16x16xf32>
    %11 = tpu.matmul %8, %9, %cst_9 {dimension_numbers = #tpu.dot_dimension_numbers<[1], [1], [0], [0], [0, 0, 1, 0], [], []>} : vector<16x8xf32>, vector<16x8xf32>, vector<16x16xf32> -> vector<16x16xf32>
    "tpu.trace_stop"() : () -> ()
    %12 = arith.addf %11, %1 : vector<16x16xf32>
    %cst_10 = arith.constant dense<0xFF800000> : vector<16xf32>
    %13 = vector.multi_reduction <maximumf>, %12, %cst_10 [1] : vector<16x16xf32> to vector<16xf32>
    %14 = vector.shape_cast %13 : vector<16xf32> to vector<16x1xf32>
    %15 = vector.broadcast %14 : vector<16x1xf32> to vector<16x16xf32>
    %16 = arith.subf %12, %15 : vector<16x16xf32>
    %17 = math.exp %16 : vector<16x16xf32>
    %cst_11 = arith.constant dense<0.000000e+00> : vector<16xf32>
    %18 = vector.multi_reduction <add>, %17, %cst_11 [1] : vector<16x16xf32> to vector<16xf32>
    %19 = vector.shape_cast %18 : vector<16xf32> to vector<16x1xf32>
    %20 = tpu.reciprocal %19 {approx = true} : vector<16x1xf32> -> vector<16x1xf32>
    %21 = vector.broadcast %20 : vector<16x1xf32> to vector<16x16xf32>
    %22 = arith.mulf %17, %21 : vector<16x16xf32>
    %cst_12 = arith.constant dense<0.000000e+00> : vector<16x8xf32>
    %23 = tpu.matmul %22, %10, %cst_12 {dimension_numbers = #tpu.dot_dimension_numbers<[1], [0], [0], [1], [0, 0, 1, 1], [], []>} : vector<16x16xf32>, vector<16x8xf32>, vector<16x8xf32> -> vector<16x8xf32>
    %24 = vector.extract_strided_slice %7 {offsets = [0, 0], sizes = [8, 32], strides = [1, 1]} : vector<32x32xf32> to vector<8x32xf32>
    %cst_13 = arith.constant dense<0.000000e+00> : vector<16x32xf32>
    %25 = tpu.matmul %23, %24, %cst_13 {dimension_numbers = #tpu.dot_dimension_numbers<[1], [0], [0], [1], [0, 0, 1, 1], [], []>} : vector<16x8xf32>, vector<8x32xf32>, vector<16x32xf32> -> vector<16x32xf32>
    %26 = vector.extract_strided_slice %6 {offsets = [0, 8], sizes = [16, 8], strides = [1, 1]} : vector<16x96xf32> to vector<16x8xf32>
    %27 = vector.extract_strided_slice %6 {offsets = [0, 40], sizes = [16, 8], strides = [1, 1]} : vector<16x96xf32> to vector<16x8xf32>
    %28 = vector.extract_strided_slice %6 {offsets = [0, 72], sizes = [16, 8], strides = [1, 1]} : vector<16x96xf32> to vector<16x8xf32>
    "tpu.trace_start"() <{level = 10 : i32, message = "qd,kd->qk"}> : () -> ()
    %cst_14 = arith.constant dense<0.000000e+00> : vector<16x16xf32>
    %29 = tpu.matmul %26, %27, %cst_14 {dimension_numbers = #tpu.dot_dimension_numbers<[1], [1], [0], [0], [0, 0, 1, 0], [], []>} : vector<16x8xf32>, vector<16x8xf32>, vector<16x16xf32> -> vector<16x16xf32>
    "tpu.trace_stop"() : () -> ()
    %30 = arith.addf %29, %1 : vector<16x16xf32>
    %cst_15 = arith.constant dense<0xFF800000> : vector<16xf32>
    %31 = vector.multi_reduction <maximumf>, %30, %cst_15 [1] : vector<16x16xf32> to vector<16xf32>
    %32 = vector.shape_cast %31 : vector<16xf32> to vector<16x1xf32>
    %33 = vector.broadcast %32 : vector<16x1xf32> to vector<16x16xf32>
    %34 = arith.subf %30, %33 : vector<16x16xf32>
    %35 = math.exp %34 : vector<16x16xf32>
    %cst_16 = arith.constant dense<0.000000e+00> : vector<16xf32>
    %36 = vector.multi_reduction <add>, %35, %cst_16 [1] : vector<16x16xf32> to vector<16xf32>
    %37 = vector.shape_cast %36 : vector<16xf32> to vector<16x1xf32>
    %38 = tpu.reciprocal %37 {approx = true} : vector<16x1xf32> -> vector<16x1xf32>
    %39 = vector.broadcast %38 : vector<16x1xf32> to vector<16x16xf32>
    %40 = arith.mulf %35, %39 : vector<16x16xf32>
    %cst_17 = arith.constant dense<0.000000e+00> : vector<16x8xf32>
    %41 = tpu.matmul %40, %28, %cst_17 {dimension_numbers = #tpu.dot_dimension_numbers<[1], [0], [0], [1], [0, 0, 1, 1], [], []>} : vector<16x16xf32>, vector<16x8xf32>, vector<16x8xf32> -> vector<16x8xf32>
    %42 = vector.extract_strided_slice %7 {offsets = [8, 0], sizes = [8, 32], strides = [1, 1]} : vector<32x32xf32> to vector<8x32xf32>
    %cst_18 = arith.constant dense<0.000000e+00> : vector<16x32xf32>
    %43 = tpu.matmul %41, %42, %cst_18 {dimension_numbers = #tpu.dot_dimension_numbers<[1], [0], [0], [1], [0, 0, 1, 1], [], []>} : vector<16x8xf32>, vector<8x32xf32>, vector<16x32xf32> -> vector<16x32xf32>
    %44 = arith.addf %25, %43 : vector<16x32xf32>
    %45 = vector.extract_strided_slice %6 {offsets = [0, 16], sizes = [16, 8], strides = [1, 1]} : vector<16x96xf32> to vector<16x8xf32>
    %46 = vector.extract_strided_slice %6 {offsets = [0, 48], sizes = [16, 8], strides = [1, 1]} : vector<16x96xf32> to vector<16x8xf32>
    %47 = vector.extract_strided_slice %6 {offsets = [0, 80], sizes = [16, 8], strides = [1, 1]} : vector<16x96xf32> to vector<16x8xf32>
    "tpu.trace_start"() <{level = 10 : i32, message = "qd,kd->qk"}> : () -> ()
    %cst_19 = arith.constant dense<0.000000e+00> : vector<16x16xf32>
    %48 = tpu.matmul %45, %46, %cst_19 {dimension_numbers = #tpu.dot_dimension_numbers<[1], [1], [0], [0], [0, 0, 1, 0], [], []>} : vector<16x8xf32>, vector<16x8xf32>, vector<16x16xf32> -> vector<16x16xf32>
    "tpu.trace_stop"() : () -> ()
    %49 = arith.addf %48, %1 : vector<16x16xf32>
    %cst_20 = arith.constant dense<0xFF800000> : vector<16xf32>
    %50 = vector.multi_reduction <maximumf>, %49, %cst_20 [1] : vector<16x16xf32> to vector<16xf32>
    %51 = vector.shape_cast %50 : vector<16xf32> to vector<16x1xf32>
    %52 = vector.broadcast %51 : vector<16x1xf32> to vector<16x16xf32>
    %53 = arith.subf %49, %52 : vector<16x16xf32>
    %54 = math.exp %53 : vector<16x16xf32>
    %cst_21 = arith.constant dense<0.000000e+00> : vector<16xf32>
    %55 = vector.multi_reduction <add>, %54, %cst_21 [1] : vector<16x16xf32> to vector<16xf32>
    %56 = vector.shape_cast %55 : vector<16xf32> to vector<16x1xf32>
    %57 = tpu.reciprocal %56 {approx = true} : vector<16x1xf32> -> vector<16x1xf32>
    %58 = vector.broadcast %57 : vector<16x1xf32> to vector<16x16xf32>
    %59 = arith.mulf %54, %58 : vector<16x16xf32>
    %cst_22 = arith.constant dense<0.000000e+00> : vector<16x8xf32>
    %60 = tpu.matmul %59, %47, %cst_22 {dimension_numbers = #tpu.dot_dimension_numbers<[1], [0], [0], [1], [0, 0, 1, 1], [], []>} : vector<16x16xf32>, vector<16x8xf32>, vector<16x8xf32> -> vector<16x8xf32>
    %61 = vector.extract_strided_slice %7 {offsets = [16, 0], sizes = [8, 32], strides = [1, 1]} : vector<32x32xf32> to vector<8x32xf32>
    %cst_23 = arith.constant dense<0.000000e+00> : vector<16x32xf32>
    %62 = tpu.matmul %60, %61, %cst_23 {dimension_numbers = #tpu.dot_dimension_numbers<[1], [0], [0], [1], [0, 0, 1, 1], [], []>} : vector<16x8xf32>, vector<8x32xf32>, vector<16x32xf32> -> vector<16x32xf32>
    %63 = arith.addf %44, %62 : vector<16x32xf32>
    %64 = vector.extract_strided_slice %6 {offsets = [0, 24], sizes = [16, 8], strides = [1, 1]} : vector<16x96xf32> to vector<16x8xf32>
    %65 = vector.extract_strided_slice %6 {offsets = [0, 56], sizes = [16, 8], strides = [1, 1]} : vector<16x96xf32> to vector<16x8xf32>
    %66 = vector.extract_strided_slice %6 {offsets = [0, 88], sizes = [16, 8], strides = [1, 1]} : vector<16x96xf32> to vector<16x8xf32>
    "tpu.trace_start"() <{level = 10 : i32, message = "qd,kd->qk"}> : () -> ()
    %cst_24 = arith.constant dense<0.000000e+00> : vector<16x16xf32>
    %67 = tpu.matmul %64, %65, %cst_24 {dimension_numbers = #tpu.dot_dimension_numbers<[1], [1], [0], [0], [0, 0, 1, 0], [], []>} : vector<16x8xf32>, vector<16x8xf32>, vector<16x16xf32> -> vector<16x16xf32>
    "tpu.trace_stop"() : () -> ()
    %68 = arith.addf %67, %1 : vector<16x16xf32>
    %cst_25 = arith.constant dense<0xFF800000> : vector<16xf32>
    %69 = vector.multi_reduction <maximumf>, %68, %cst_25 [1] : vector<16x16xf32> to vector<16xf32>
    %70 = vector.shape_cast %69 : vector<16xf32> to vector<16x1xf32>
    %71 = vector.broadcast %70 : vector<16x1xf32> to vector<16x16xf32>
    %72 = arith.subf %68, %71 : vector<16x16xf32>
    %73 = math.exp %72 : vector<16x16xf32>
    %cst_26 = arith.constant dense<0.000000e+00> : vector<16xf32>
    %74 = vector.multi_reduction <add>, %73, %cst_26 [1] : vector<16x16xf32> to vector<16xf32>
    %75 = vector.shape_cast %74 : vector<16xf32> to vector<16x1xf32>
    %76 = tpu.reciprocal %75 {approx = true} : vector<16x1xf32> -> vector<16x1xf32>
    %77 = vector.broadcast %76 : vector<16x1xf32> to vector<16x16xf32>
    %78 = arith.mulf %73, %77 : vector<16x16xf32>
    %cst_27 = arith.constant dense<0.000000e+00> : vector<16x8xf32>
    %79 = tpu.matmul %78, %66, %cst_27 {dimension_numbers = #tpu.dot_dimension_numbers<[1], [0], [0], [1], [0, 0, 1, 1], [], []>} : vector<16x16xf32>, vector<16x8xf32>, vector<16x8xf32> -> vector<16x8xf32>
    %80 = vector.extract_strided_slice %7 {offsets = [24, 0], sizes = [8, 32], strides = [1, 1]} : vector<32x32xf32> to vector<8x32xf32>
    %cst_28 = arith.constant dense<0.000000e+00> : vector<16x32xf32>
    %81 = tpu.matmul %79, %80, %cst_28 {dimension_numbers = #tpu.dot_dimension_numbers<[1], [0], [0], [1], [0, 0, 1, 1], [], []>} : vector<16x8xf32>, vector<8x32xf32>, vector<16x32xf32> -> vector<16x32xf32>
    %82 = arith.addf %63, %81 : vector<16x32xf32>
    %c0_29 = arith.constant 0 : index
    %c0_30 = arith.constant 0 : index
    %83 = vector.load %arg5[%c0_29, %c0_30] : memref<1x32xf32, #tpu.memory_space<vmem>>, vector<1x32xf32>
    %84 = vector.broadcast %83 : vector<1x32xf32> to vector<16x32xf32>
    %85 = arith.addf %82, %84 : vector<16x32xf32>
    %86 = arith.addf %0, %85 : vector<16x32xf32>
    %cst_31 = arith.constant dense<0.000000e+00> : vector<16xf32>
    %87 = vector.multi_reduction <add>, %86, %cst_31 [1] : vector<16x32xf32> to vector<16xf32>
    %88 = vector.shape_cast %87 : vector<16xf32> to vector<16x1xf32>
    %cst_32 = arith.constant 3.200000e+01 : f32
    %89 = vector.broadcast %cst_32 : f32 to vector<16x1xf32>
    %90 = arith.divf %88, %89 : vector<16x1xf32>
    %91 = vector.broadcast %90 : vector<16x1xf32> to vector<16x32xf32>
    %92 = arith.subf %86, %91 : vector<16x32xf32>
    %93 = arith.mulf %92, %92 : vector<16x32xf32>
    %cst_33 = arith.constant dense<0.000000e+00> : vector<16xf32>
    %94 = vector.multi_reduction <add>, %93, %cst_33 [1] : vector<16x32xf32> to vector<16xf32>
    %95 = vector.shape_cast %94 : vector<16xf32> to vector<16x1xf32>
    %cst_34 = arith.constant 3.200000e+01 : f32
    %96 = vector.broadcast %cst_34 : f32 to vector<16x1xf32>
    %97 = arith.divf %95, %96 : vector<16x1xf32>
    %cst_35 = arith.constant 9.99999974E-6 : f32
    %98 = vector.broadcast %cst_35 : f32 to vector<16x1xf32>
    %99 = arith.addf %97, %98 : vector<16x1xf32>
    %100 = math.rsqrt %99 : vector<16x1xf32>
    %101 = vector.broadcast %100 : vector<16x1xf32> to vector<16x32xf32>
    %102 = arith.mulf %92, %101 : vector<16x32xf32>
    %c0_36 = arith.constant 0 : index
    %c0_37 = arith.constant 0 : index
    %103 = vector.load %arg6[%c0_36, %c0_37] : memref<1x32xf32, #tpu.memory_space<vmem>>, vector<1x32xf32>
    %104 = vector.broadcast %103 : vector<1x32xf32> to vector<16x32xf32>
    %105 = arith.mulf %102, %104 : vector<16x32xf32>
    %c0_38 = arith.constant 0 : index
    %c0_39 = arith.constant 0 : index
    %106 = vector.load %arg7[%c0_38, %c0_39] : memref<1x32xf32, #tpu.memory_space<vmem>>, vector<1x32xf32>
    %107 = vector.broadcast %106 : vector<1x32xf32> to vector<16x32xf32>
    %108 = arith.addf %105, %107 : vector<16x32xf32>
    %c0_40 = arith.constant 0 : index
    %c0_41 = arith.constant 0 : index
    %109 = vector.load %arg8[%c0_40, %c0_41] : memref<32x128xf32, #tpu.memory_space<vmem>>, vector<32x128xf32>
    %cst_42 = arith.constant dense<0.000000e+00> : vector<16x128xf32>
    %110 = tpu.matmul %108, %109, %cst_42 {dimension_numbers = #tpu.dot_dimension_numbers<[1], [0], [0], [1], [0, 0, 1, 1], [], []>} : vector<16x32xf32>, vector<32x128xf32>, vector<16x128xf32> -> vector<16x128xf32>
    %c0_43 = arith.constant 0 : index
    %c0_44 = arith.constant 0 : index
    %111 = vector.load %arg9[%c0_43, %c0_44] : memref<1x128xf32, #tpu.memory_space<vmem>>, vector<1x128xf32>
    %112 = vector.broadcast %111 : vector<1x128xf32> to vector<16x128xf32>
    %113 = arith.addf %110, %112 : vector<16x128xf32>
    %cst_45 = arith.constant 0.000000e+00 : f32
    %114 = vector.broadcast %cst_45 : f32 to vector<16x128xf32>
    %115 = arith.maximumf %113, %114 : vector<16x128xf32>
    %c0_46 = arith.constant 0 : index
    %c0_47 = arith.constant 0 : index
    %116 = vector.load %arg10[%c0_46, %c0_47] : memref<128x32xf32, #tpu.memory_space<vmem>>, vector<128x32xf32>
    %cst_48 = arith.constant dense<0.000000e+00> : vector<16x32xf32>
    %117 = tpu.matmul %115, %116, %cst_48 {dimension_numbers = #tpu.dot_dimension_numbers<[1], [0], [0], [1], [0, 0, 1, 1], [], []>} : vector<16x128xf32>, vector<128x32xf32>, vector<16x32xf32> -> vector<16x32xf32>
    %c0_49 = arith.constant 0 : index
    %c0_50 = arith.constant 0 : index
    %118 = vector.load %arg11[%c0_49, %c0_50] : memref<1x32xf32, #tpu.memory_space<vmem>>, vector<1x32xf32>
    %119 = vector.broadcast %118 : vector<1x32xf32> to vector<16x32xf32>
    %120 = arith.addf %117, %119 : vector<16x32xf32>
    %121 = arith.addf %108, %120 : vector<16x32xf32>
    %cst_51 = arith.constant dense<0.000000e+00> : vector<16xf32>
    %122 = vector.multi_reduction <add>, %121, %cst_51 [1] : vector<16x32xf32> to vector<16xf32>
    %123 = vector.shape_cast %122 : vector<16xf32> to vector<16x1xf32>
    %cst_52 = arith.constant 3.200000e+01 : f32
    %124 = vector.broadcast %cst_52 : f32 to vector<16x1xf32>
    %125 = arith.divf %123, %124 : vector<16x1xf32>
    %126 = vector.broadcast %125 : vector<16x1xf32> to vector<16x32xf32>
    %127 = arith.subf %121, %126 : vector<16x32xf32>
    %128 = arith.mulf %127, %127 : vector<16x32xf32>
    %cst_53 = arith.constant dense<0.000000e+00> : vector<16xf32>
    %129 = vector.multi_reduction <add>, %128, %cst_53 [1] : vector<16x32xf32> to vector<16xf32>
    %130 = vector.shape_cast %129 : vector<16xf32> to vector<16x1xf32>
    %cst_54 = arith.constant 3.200000e+01 : f32
    %131 = vector.broadcast %cst_54 : f32 to vector<16x1xf32>
    %132 = arith.divf %130, %131 : vector<16x1xf32>
    %cst_55 = arith.constant 9.99999974E-6 : f32
    %133 = vector.broadcast %cst_55 : f32 to vector<16x1xf32>
    %134 = arith.addf %132, %133 : vector<16x1xf32>
    %135 = math.rsqrt %134 : vector<16x1xf32>
    %136 = vector.broadcast %135 : vector<16x1xf32> to vector<16x32xf32>
    %137 = arith.mulf %127, %136 : vector<16x32xf32>
    %c0_56 = arith.constant 0 : index
    %c0_57 = arith.constant 0 : index
    %138 = vector.load %arg12[%c0_56, %c0_57] : memref<1x32xf32, #tpu.memory_space<vmem>>, vector<1x32xf32>
    %139 = vector.broadcast %138 : vector<1x32xf32> to vector<16x32xf32>
    %140 = arith.mulf %137, %139 : vector<16x32xf32>
    %c0_58 = arith.constant 0 : index
    %c0_59 = arith.constant 0 : index
    %141 = vector.load %arg13[%c0_58, %c0_59] : memref<1x32xf32, #tpu.memory_space<vmem>>, vector<1x32xf32>
    %142 = vector.broadcast %141 : vector<1x32xf32> to vector<16x32xf32>
    %143 = arith.addf %140, %142 : vector<16x32xf32>
    %c0_60 = arith.constant 0 : index
    %c0_61 = arith.constant 0 : index
    %144 = vector.load %arg14[%c0_60, %c0_61] : memref<16x32xf32, #tpu.memory_space<vmem>>, vector<16x32xf32>
    tpu.vector_store %arg14[%c0_60, %c0_61], %143 {strides = array<i32>} : memref<16x32xf32, #tpu.memory_space<vmem>>, vector<16x32xf32>,
    return
  }
}

</mosaic_0001>

<bundles_post_ra>
// kernel: transformer_block.1
= control target key start
LH: loop header
LB: loop body
LE: loop exit
PB: predicated region body
PF: predicated region fallthrough
CT: control target
= control target key end

     0   :  { %vm63_vm0 = vcmask 261120   ;;  %s2266_s0 = inlined_call_operand.vmem [shape: f32[16,32], index: 0, kind: input, shape index: {}]   ;;  %s2267_s1 = inlined_call_operand.vmem [shape: f32[16,16], index: 1, kind: input, shape index: {}]   ;;  %s2268_s2 = inlined_call_operand.vmem [shape: f32[32,96], index: 2, kind: input, shape index: {}]   ;;  %s2269_s3 = inlined_call_operand.vmem [shape: f32[1,96], index: 3, kind: input, shape index: {}]   ;;  %s2270_s4 = inlined_call_operand.vmem [shape: f32[32,32], index: 4, kind: input, shape index: {}]   ;;  %s2271_s5 = inlined_call_operand.vmem [shape: f32[1,32], index: 5, kind: input, shape index: {}]   ;;  %s2272_s6 = inlined_call_operand.vmem [shape: f32[1,32], index: 6, kind: input, shape index: {}]   ;;  %s2273_s7 = inlined_call_operand.vmem [shape: f32[1,32], index: 7, kind: input, shape index: {}]   ;;  %s2274_s8 = inlined_call_operand.vmem [shape: f32[32,128], index: 8, kind: input, shape index: {}]   ;;  %s2275_s9 = inlined_call_operand.vmem [shape: f32[1,128], index: 9, kind: input, shape index: {}]   ;;  %s2276_s10 = inlined_call_operand.vmem [shape: f32[128,32], index: 10, kind: input, shape index: {}]   ;;  %s2277_s11 = inlined_call_operand.vmem [shape: f32[1,32], index: 11, kind: input, shape index: {}]   ;;  %s2278_s12 = inlined_call_operand.vmem [shape: f32[1,32], index: 12, kind: input, shape index: {}]   ;;  %s2279_s13 = inlined_call_operand.vmem [shape: f32[1,32], index: 13, kind: input, shape index: {}]   ;;  %s2280_s14 = inlined_call_operand.hbm [shape: f32[16,32], index: 14, kind: output, shape index: {}]  }
   0x1   :  { %v55_v0 = vld [vmem:[%s2268_s2 + $0x18] sm:$0xff]  ;;  %v54_v1 = vld [vmem:[%s2268_s2 + $0x10] sm:$0xff]  ;;  %v2014_v2 = vld [vmem:[%s2266_s0] sm:$0xff] }
   0x2   :  { %1707 = vmatprep.subr.mxu0 %v55_v0  ;;  %v53_v3 = vld [vmem:[%s2268_s2 + $0x8] sm:$0xff]  ;;  %1715 = vmatprep.mubr.msk.f32.mxu0 %vm63_vm0, %v2014_v2 }
   0x3   :  { %1708 = vmatpush3.msra.mxu0 %v55_v0 }
   0x4   :  { %19 = vsyncpa [#allocation3], 0  ;;  %1709 = vmatprep.subr.mxu0 %v54_v1  ;;  %v52_v4 = vld [vmem:[%s2268_s2] sm:$0xff]  ;;  %v2027_v5 = vld [vmem:[%s2266_s0 + $0x8] sm:$0xff]  ;;  %vm155_vm1 = vcmask 64512   ;;  %s1916_s2 = smov 88  }
   0x5   :  { %1710 = vmatpush3.msra.mxu0 %v54_v1  ;;  %v1589_v6 = vld [vmem:[%s2269_s3] ss:$0 sm:$0xff]  ;;  %s1917_s0 = smov 96   ;;  %s1918_s3 = smov 120   ;;  %v2061_v17 = vld [vmem:[%s2267_s1 + $0x8] sm:$0xff]  ;;  %vm239_vm2 = vcmask 130048  }
   0x6   :  { %1711 = vmatprep.subr.mxu0 %v53_v3  ;;  %v2066_v19 = vld [vmem:[%s2267_s1] sm:$0xff]  ;;  %s1919_s1 = smov 64   ;;  %s1920_s15 = smov 56  }
   0x7   :  { %1712 = vmatpush3.msra.mxu0 %v53_v3  ;;  %s1921_s16 = smov 80   ;;  %s1922_s17 = smov 112  }
   0x8   :  { %1713 = vmatprep.subr.mxu0 %v52_v4  ;;  %s1923_s18 = smov 72   ;;  %s1924_s19 = smov 104  }
   0x9   :  { %1714 = vmatpush3.msra.mxu0 %v52_v4  ;;  %v146_v4 = vld [vmem:[%s2270_s4 + $0x8] sm:$0xff]  ;;  %s1925_s24 = smov 48   ;;  %s1926_s25 = smov 40  }
   0xa   :  { %1716 = vmatmul.mubr.msk.f32.vlgmr.msra.gmra.mxu0 %vm63_vm0, %v2027_v5 }
  0xca   :  { %v1717_v7 = vpop.f32.mrf.mxu0 }
  0xcb   :  { %v2034_v8 = vadd.f32 %v1717_v7, %v1589_v6 }
  0xcc   :  { %v136_v9 = vpop.f32.mrf.mxu0 }
  0xcd   :  { %v2036_v10 = vadd.f32 %v1589_v6, %v136_v9  ;;  %355 = vrot.lane.b32.xlu1 %v2034_v8, %s1916_s2  ;;  %153 = vrot.lane.b32.xlu0 %v2034_v8, %s1917_s0  ;;  %v145_v6 = vld [vmem:[%s2270_s4] sm:$0xff] }
  0xcf   :  { %1722 = vmatprep.mubr.msk.f32.mxu0 %vm155_vm1, %v2036_v10 }
  0xd1   :  { %353 = vrot.lane.b32.xlu1 %v2036_v10, %s1916_s2  ;;  %151 = vrot.lane.b32.xlu0 %v2036_v10, %s1917_s0 }
  0xd5   :  { %351 = vrot.lane.b32.xlu1 %v2034_v8, %s1918_s3  ;;  %349 = vrot.lane.b32.xlu0 %v2036_v10, %s1918_s3 }
 0x13f   :  { %v356_v11 = vpop.permute.xlu1 %355  ;;  %v154_v12 = vpop.permute.xlu0 %153 }
 0x140   :  { %1718 = vmatprep.subr.msk.mxu0 %vm155_vm1, %v154_v12  ;;  %1732 = vmatprep.subr.msk.mxu1 %vm155_vm1, %v356_v11 }
 0x141   :  { %1719 = vmatpush3.xpose.msk.msra.mxu0 %vm155_vm1, %v154_v12  ;;  %1733 = vmatpush3.xpose.msk.msra.mxu1 %vm155_vm1, %v356_v11 }
 0x143   :  { %v354_v13 = vpop.permute.xlu1 %353  ;;  %v152_v14 = vpop.permute.xlu0 %151 }
 0x144   :  { %1720 = vmatprep.subr.msk.mxu0 %vm155_vm1, %v152_v14  ;;  %1734 = vmatprep.subr.msk.mxu1 %vm155_vm1, %v354_v13 }
 0x145   :  { %1721 = vmatpush3.xpose.msk.msra.mxu0 %vm155_vm1, %v152_v14  ;;  %1735 = vmatpush3.xpose.msk.msra.mxu1 %vm155_vm1, %v354_v13 }
 0x147   :  { %v352_v15 = vpop.permute.xlu1 %351  ;;  %v350_v16 = vpop.permute.xlu0 %349 }
 0x148   :  { %1723 = vmatmul.mubr.msk.f32.vlgmr.msra.gmra.mxu0 %vm155_vm1, %v2034_v8  ;;  %1736 = vmatprep.mubr.msk.f32.mxu1 %vm155_vm1, %v350_v16 }
 0x149   :  { %1737 = vmatmul.mubr.msk.f32.vlgmr.msra.gmra.mxu1 %vm155_vm1, %v352_v15 }
 0x208   :  { %v1724_v18 = vpop.f32.mrf.mxu0 }
 0x209   :  { %v236_v20 = vadd.f32 %v1724_v18, %v2061_v17  ;;  %v1738_v21 = vpop.f32.mrf.mxu1 }
 0x20a   :  { %v230_v22 = vpop.f32.mrf.mxu0  ;;  %v437_v28 = vadd.f32 %v1738_v21, %v2061_v17 }
 0x20b   :  { %v231_v23 = vadd.f32 %v230_v22, %v2066_v19  ;;  %v431_v24 = vpop.f32.mrf.mxu1  ;;  %v243_v25 = vsel %vm239_vm2, %v236_v20, -inf }
 0x20c   :  { %244 = vmax.xlane.f32.xlu1 %v243_v25  ;;  %v432_v26 = vadd.f32 %v431_v24, %v2066_v19  ;;  %v443_v30 = vsel %vm239_vm2, %v437_v28, -inf }
 0x20d   :  { %v240_v27 = vsel %vm239_vm2, %v231_v23, -inf }
 0x20e   :  { %241 = vmax.xlane.f32.xlu0 %v240_v27  ;;  %v440_v29 = vsel %vm239_vm2, %v432_v26, -inf }
 0x212   :  { %441 = vmax.xlane.f32.xlu0 %v440_v29 }
 0x216   :  { %444 = vmax.xlane.f32.xlu0 %v443_v30 }
 0x21d   :  { %264 = vrot.lane.b32.xlu1 %v2034_v8, %s1919_s1 }
 0x221   :  { %464 = vrot.lane.b32.xlu1 %v2034_v8, %s1920_s15 }
 0x295   :  { %v245_v31 = vpop.xlane.xlu1 %244 }
 0x296   :  { %v247_v32 = vsub.f32 %v236_v20, %v245_v31 }
 0x297   :  { %v242_v33 = vpop.xlane.xlu0 %241 }
 0x298   :  { %v250_v34 = vmul.f32 1.442695, %v247_v32  ;;  %v246_v35 = vsub.f32 %v231_v23, %v242_v33 }
 0x299   :  { %v265_v36 = vpop.permute.xlu1 %264 }
 0x29a   :  { %1854 = vpow2.f32 %v250_v34  ;;  %v248_v37 = vmul.f32 1.442695, %v246_v35  ;;  %1725 = vmatprep.subr.mxu0 %v265_v36 }
 0x29b   :  { %1726 = vmatpush3.msra.mxu0 %v265_v36  ;;  %v442_v38 = vpop.xlane.xlu0 %441 }
 0x29c   :  { %1856 = vpow2.f32 %v248_v37  ;;  %v446_v39 = vsub.f32 %v432_v26, %v442_v38 }
 0x29d   :  { %v465_v52 = vpop.permute.xlu1 %464 }
 0x29e   :  { %v448_v40 = vmul.f32 1.442695, %v446_v39 }
 0x29f   :  { %v445_v41 = vpop.xlane.xlu0 %444 }
 0x2a0   :  { %1858 = vpow2.f32 %v448_v40  ;;  %v447_v42 = vsub.f32 %v437_v28, %v445_v41 }
 0x2a2   :  { %v450_v43 = vmul.f32 1.442695, %v447_v42 }
 0x2a4   :  { %1860 = vpow2.f32 %v450_v43 }
 0x2a7   :  { %v1855_v44 = vpop.eup %1854 }
 0x2a8   :  { %v255_v45 = vsel %vm239_vm2, %v1855_v44, 0.0 }
 0x2a9   :  { %v1857_v46 = vpop.eup %1856  ;;  %256 = vadd.xlane.f32.xlu0 %v255_v45 }
 0x2aa   :  { %v252_v47 = vsel %vm239_vm2, %v1857_v46, 0.0 }
 0x2ab   :  { %253 = vadd.xlane.f32.xlu1 %v252_v47 }
 0x2ad   :  { %v1859_v48 = vpop.eup %1858 }
 0x2ae   :  { %v452_v49 = vsel %vm239_vm2, %v1859_v48, 0.0 }
 0x2af   :  { %453 = vadd.xlane.f32.xlu1 %v452_v49 }
 0x2b1   :  { %v1861_v50 = vpop.eup %1860 }
 0x2b2   :  { %v455_v51 = vsel %vm239_vm2, %v1861_v50, 0.0 }
 0x2b3   :  { %456 = vadd.xlane.f32.xlu0 %v455_v51 }
 0x2c0   :  { %462 = vrot.lane.b32.xlu1 %v2036_v10, %s1920_s15 }
 0x2c4   :  { %715 = vrot.lane.b32.xlu1 %v2036_v10, %s1921_s16 }
 0x2c8   :  { %713 = vrot.lane.b32.xlu1 %v2034_v8, %s1922_s17 }
 0x2c9   :  { %262 = vrot.lane.b32.xlu0 %v2036_v10, %s1919_s1 }
 0x2cc   :  { %998 = vrot.lane.b32.xlu1 %v2036_v10, %s1923_s18 }
 0x2cd   :  { %717 = vrot.lane.b32.xlu0 %v2034_v8, %s1921_s16 }
 0x2d0   :  { %996 = vrot.lane.b32.xlu1 %v2034_v8, %s1924_s19 }
 0x2d1   :  { %711 = vrot.lane.b32.xlu0 %v2036_v10, %s1922_s17 }
 0x2d5   :  { %1000 = vrot.lane.b32.xlu0 %v2034_v8, %s1923_s18 }
 0x2d9   :  { %994 = vrot.lane.b32.xlu0 %v2036_v10, %s1924_s19 }
 0x332   :  { %v257_v53 = vpop.xlane.xlu0 %256 }
 0x333   :  { %1862 = vrcp.f32 %v257_v53 }
 0x334   :  { %v254_v54 = vpop.xlane.xlu1 %253 }
 0x335   :  { %1864 = vrcp.f32 %v254_v54 }
 0x338   :  { %v454_v55 = vpop.xlane.xlu1 %453 }
 0x339   :  { %1866 = vrcp.f32 %v454_v55 }
 0x33c   :  { %v457_v56 = vpop.xlane.xlu0 %456  ;;  %v463_v63 = vpop.permute.xlu1 %462 }
 0x33d   :  { %1868 = vrcp.f32 %v457_v56 }
 0x340   :  { %v263_v57 = vpop.permute.xlu0 %262  ;;  %v1863_v58 = vpop.eup %1862 }
 0x341   :  { %1727 = vmatprep.subr.mxu0 %v263_v57  ;;  %v261_v61 = vmul.f32 %v1863_v58, %v1855_v44  ;;  %v716_v15 = vpop.permute.xlu1 %715 }
 0x342   :  { %v1865_v59 = vpop.eup %1864  ;;  %1728 = vmatpush3.msra.mxu0 %v263_v57 }
 0x343   :  { %1739 = vmatprep.subr.mxu0 %v465_v52  ;;  %v260_v60 = vmul.f32 %v1865_v59, %v1857_v46  ;;  %v147_v59 = vld [vmem:[%s2270_s4 + $0x10] sm:$0xff] }
 0x344   :  { %v718_v9 = vpop.permute.xlu0 %717 }
 0x345   :  { %1729 = vmatprep.mubr.msk.f32.mxu0 %vm239_vm2, %v260_v60  ;;  %v714_v18 = vpop.permute.xlu1 %713 }
 0x346   :  { %v1867_v62 = vpop.eup %1866  ;;  %1730 = vmatmul.mubr.msk.f32.vlgmr.msra.gmra.mxu0 %vm239_vm2, %v261_v61 }
 0x347   :  { %1740 = vmatpush3.msra.mxu0 %v465_v52  ;;  %v460_v0 = vmul.f32 %v1867_v62, %v1859_v48 }
 0x348   :  { %1741 = vmatprep.subr.mxu0 %v463_v63  ;;  %v712_v14 = vpop.permute.xlu0 %711 }
 0x349   :  { %1742 = vmatpush3.msra.mxu0 %v463_v63  ;;  %1743 = vmatprep.mubr.msk.f32.mxu0 %vm239_vm2, %v460_v0  ;;  %v999_v21 = vpop.permute.xlu1 %998 }
 0x34a   :  { %v1869_v1 = vpop.eup %1868  ;;  %1746 = vmatprep.subr.mxu0 %v146_v4 }
 0x34b   :  { %v461_v3 = vmul.f32 %v1869_v1, %v1861_v50 }
 0x34c   :  { %v1001_v16 = vpop.permute.xlu0 %1000 }
 0x34d   :  { %1744 = vmatmul.mubr.msk.f32.vlgmr.msra.gmra.mxu0 %vm239_vm2, %v461_v3  ;;  %v997_v22 = vpop.permute.xlu1 %996 }
 0x34e   :  { %1747 = vmatpush3.msra.mxu0 %v146_v4 }
 0x34f   :  { %1751 = vmatprep.subr.mxu0 %v145_v6 }
 0x350   :  { %v995_v20 = vpop.permute.xlu0 %994 }
 0x406   :  { %v1731_v7 = vpop.f32.mrf.mxu0 }
 0x408   :  { %v340_v11 = vpop.f32.mrf.mxu0 }
 0x40d   :  { %v1745_v12 = vpop.f32.mrf.mxu0 }
 0x40f   :  { %v540_v13 = vpop.f32.mrf.mxu0 }
 0x410   :  { %1748 = vmatprep.mubr.msk.f32.mxu0 %vm155_vm1, %v540_v13 }
 0x411   :  { %1749 = vmatmul.mubr.msk.f32.vlgmr.msra.gmra.mxu0 %vm155_vm1, %v1745_v12 }
 0x412   :  { %1752 = vmatpush3.msra.mxu0 %v145_v6  ;;  %1753 = vmatprep.mubr.msk.f32.mxu0 %vm155_vm1, %v340_v11 }
 0x413   :  { %1756 = vmatprep.subr.msk.mxu0 %vm155_vm1, %v718_v9 }
 0x415   :  { %1754 = vmatmul.mubr.msk.f32.vlgmr.msra.gmra.mxu0 %vm155_vm1, %v1731_v7 }
 0x416   :  { %1757 = vmatpush3.xpose.msk.msra.mxu0 %vm155_vm1, %v718_v9  ;;  %1760 = vmatprep.mubr.msk.f32.mxu0 %vm155_vm1, %v712_v14 }
 0x417   :  { %1758 = vmatprep.subr.msk.mxu0 %vm155_vm1, %v716_v15 }
 0x41a   :  { %1759 = vmatpush3.xpose.msk.msra.mxu0 %vm155_vm1, %v716_v15 }
 0x41b   :  { %1775 = vmatprep.subr.msk.mxu0 %vm155_vm1, %v1001_v16 }
 0x41d   :  { %1761 = vmatmul.mubr.msk.f32.vlgmr.msra.gmra.mxu0 %vm155_vm1, %v714_v18 }
 0x41e   :  { %1776 = vmatpush3.xpose.msk.msra.mxu0 %vm155_vm1, %v1001_v16  ;;  %1779 = vmatprep.mubr.msk.f32.mxu0 %vm155_vm1, %v995_v20 }
 0x41f   :  { %1777 = vmatprep.subr.msk.mxu0 %vm155_vm1, %v999_v21 }
 0x422   :  { %1778 = vmatpush3.xpose.msk.msra.mxu0 %vm155_vm1, %v999_v21 }
 0x425   :  { %1780 = vmatmul.mubr.msk.f32.vlgmr.msra.gmra.mxu0 %vm155_vm1, %v997_v22 }
 0x4d1   :  { %v1750_v23 = vpop.f32.mrf.mxu0 }
 0x4d3   :  { %v621_v24 = vpop.f32.mrf.mxu0 }
 0x4d5   :  { %v1755_v25 = vpop.f32.mrf.mxu0 }
 0x4d6   :  { %v2122_v26 = vadd.f32 %v1755_v25, %v1750_v23 }
 0x4d7   :  { %v702_v27 = vpop.f32.mrf.mxu0 }
 0x4d8   :  { %v2124_v28 = vadd.f32 %v702_v27, %v621_v24  ;;  %v1624_v27 = vld [vmem:[%s2271_s5] ss:$0 sm:$0xff]  ;;  %s1927_s5 = smov [#allocation2]  }
 0x4d9   :  { %s1578_s29 = sshll.u32 %s1927_s5, 4  ;;  %s1579_s29 = int_to_ptr.vmem [resolvable:$true] %s1578_s29 }
 0x4da   :  { %s1894_s30 = scalar_lea.vmem %s1579_s29, 256  ;;  %p1899_p1 = scmp.lt.s32.totalorder %s1579_s29, %s1579_s29 }
 0x4db   :  { %p1895_p0 = scmp.ne.s32.totalorder %s1579_s29, %s1894_s30  ;;  %p1900_p2 = scmp.lt.s32.totalorder %s1894_s30, %s1894_s30 }
 0x4dd   :  { %v1762_v29 = vpop.f32.mrf.mxu0  ;;  %p1901_p3 = por %p1900_p2, %p1899_p1 }
 0x4de   :  { %v799_v30 = vadd.f32 %v1762_v29, %v2061_v17 }
 0x4df   :  { %v793_v31 = vpop.f32.mrf.mxu0  ;;  %p1902_p4 = pnand %p1901_p3, %p1895_p0 }
 0x4e0   :  { %v794_v32 = vadd.f32 %v793_v31, %v2066_v19  ;;  %v805_v33 = vsel %vm239_vm2, %v799_v30, -inf }
 0x4e1   :  { %806 = vmax.xlane.f32.xlu1 %v805_v33 }
 0x4e2   :  { %v802_v34 = vsel %vm239_vm2, %v794_v32, -inf }
 0x4e3   :  { %803 = vmax.xlane.f32.xlu0 %v802_v34 }
 0x4e5   :  { %v1781_v35 = vpop.f32.mrf.mxu0 }
 0x4e6   :  { %v1082_v53 = vadd.f32 %v1781_v35, %v2061_v17 }
 0x4e7   :  { %v1076_v36 = vpop.f32.mrf.mxu0 }
 0x4e8   :  { %v1077_v37 = vadd.f32 %v1076_v36, %v2066_v19  ;;  %v1088_v55 = vsel %vm239_vm2, %v1082_v53, -inf }
 0x4ea   :  { %v1085_v38 = vsel %vm239_vm2, %v1077_v37, -inf }
 0x4f2   :  { %826 = vrot.lane.b32.xlu1 %v2034_v8, %s1925_s24 }
 0x516   :  { %1086 = vmax.xlane.f32.xlu1 %v1085_v38 }
 0x56a   :  { %v807_v39 = vpop.xlane.xlu1 %806 }
 0x56b   :  { %v809_v40 = vsub.f32 %v799_v30, %v807_v39 }
 0x56c   :  { %v804_v41 = vpop.xlane.xlu0 %803 }
 0x56d   :  { %v812_v42 = vmul.f32 1.442695, %v809_v40  ;;  %v808_v43 = vsub.f32 %v794_v32, %v804_v41 }
 0x56e   :  { %v827_v44 = vpop.permute.xlu1 %826 }
 0x56f   :  { %1870 = vpow2.f32 %v812_v42  ;;  %v810_v45 = vmul.f32 1.442695, %v808_v43  ;;  %1763 = vmatprep.subr.mxu1 %v827_v44 }
 0x570   :  { %1764 = vmatpush3.msra.mxu1 %v827_v44  ;;  %v1336_v44 = vld [vmem:[%s2274_s8 + $0x18] sm:$0xff] }
 0x571   :  { %1872 = vpow2.f32 %v810_v45  ;;  %v1335_v45 = vld [vmem:[%s2274_s8 + $0x10] sm:$0xff]  ;;  %1794 = vmatprep.subr.mxu0 %v1336_v44 }
 0x572   :  { %1795 = vmatpush3.msra.mxu0 %v1336_v44 }
 0x573   :  { %1796 = vmatprep.subr.mxu0 %v1335_v45 }
 0x574   :  { %1797 = vmatpush3.msra.mxu0 %v1335_v45 }
 0x57c   :  { %v1871_v46 = vpop.eup %1870 }
 0x57d   :  { %v817_v47 = vsel %vm239_vm2, %v1871_v46, 0.0 }
 0x57e   :  { %v1873_v48 = vpop.eup %1872  ;;  %818 = vadd.xlane.f32.xlu0 %v817_v47  ;;  %v1333_v47 = vld [vmem:[%s2274_s8] sm:$0xff] }
 0x57f   :  { %v814_v19 = vsel %vm239_vm2, %v1873_v48, 0.0 }
 0x582   :  { %815 = vadd.xlane.f32.xlu0 %v814_v19  ;;  %v1441_v19 = vld [vmem:[%s2276_s10 + $0x70] sm:$0xff] }
 0x598   :  { %824 = vrot.lane.b32.xlu0 %v2036_v10, %s1925_s24 }
 0x59f   :  { %v1087_v49 = vpop.xlane.xlu1 %1086 }
 0x5a0   :  { %v1091_v50 = vsub.f32 %v1077_v37, %v1087_v49  ;;  %v1440_v49 = vld [vmem:[%s2276_s10 + $0x68] sm:$0xff] }
 0x5a2   :  { %v1093_v51 = vmul.f32 1.442695, %v1091_v50  ;;  %v1439_v50 = vld [vmem:[%s2276_s10 + $0x60] sm:$0xff] }
 0x5a4   :  { %1874 = vpow2.f32 %v1093_v51  ;;  %v1438_v51 = vld [vmem:[%s2276_s10 + $0x58] sm:$0xff] }
 0x5b1   :  { %v1875_v52 = vpop.eup %1874 }
 0x5b2   :  { %v1097_v54 = vsel %vm239_vm2, %v1875_v52, 0.0 }
 0x5b3   :  { %1098 = vadd.xlane.f32.xlu1 %v1097_v54  ;;  %v1435_v54 = vld [vmem:[%s2276_s10 + $0x40] sm:$0xff] }
 0x5b7   :  { %1089 = vmax.xlane.f32.xlu0 %v1088_v55  ;;  %v1434_v55 = vld [vmem:[%s2276_s10 + $0x38] sm:$0xff] }
 0x5c4   :  { %1109 = vrot.lane.b32.xlu1 %v2034_v8, %s1926_s25 }
 0x607   :  { %v819_v56 = vpop.xlane.xlu0 %818 }
 0x608   :  { %1876 = vrcp.f32 %v819_v56  ;;  %v1433_v56 = vld [vmem:[%s2276_s10 + $0x30] sm:$0xff] }
 0x60b   :  { %v816_v57 = vpop.xlane.xlu0 %815 }
 0x60c   :  { %1878 = vrcp.f32 %v816_v57  ;;  %v1432_v57 = vld [vmem:[%s2276_s10 + $0x28] sm:$0xff] }
 0x60f   :  { %v825_v58 = vpop.permute.xlu0 %824 }
 0x610   :  { %1765 = vmatprep.subr.mxu1 %v825_v58 }
 0x611   :  { %1766 = vmatpush3.msra.mxu1 %v825_v58  ;;  %v1431_v58 = vld [vmem:[%s2276_s10 + $0x20] sm:$0xff] }
 0x612   :  { %1770 = vmatprep.subr.mxu1 %v147_v59 }
 0x615   :  { %v1877_v17 = vpop.eup %1876 }
 0x616   :  { %v823_v62 = vmul.f32 %v1877_v17, %v1871_v46  ;;  %v1334_v46 = vld [vmem:[%s2274_s8 + $0x8] sm:$0xff] }
 0x617   :  { %1798 = vmatprep.subr.mxu0 %v1334_v46 }
 0x618   :  { %1799 = vmatpush3.msra.mxu0 %v1334_v46 }
 0x619   :  { %v1879_v60 = vpop.eup %1878  ;;  %1800 = vmatprep.subr.mxu0 %v1333_v47 }
 0x61a   :  { %v822_v61 = vmul.f32 %v1879_v60, %v1873_v48  ;;  %1801 = vmatpush3.msra.mxu0 %v1333_v47  ;;  %v1442_v48 = vld [vmem:[%s2276_s10 + $0x78] sm:$0xff] }
 0x61c   :  { %1767 = vmatprep.mubr.msk.f32.mxu1 %vm239_vm2, %v822_v61 }
 0x61d   :  { %1768 = vmatmul.mubr.msk.f32.vlgmr.msra.gmra.mxu1 %vm239_vm2, %v823_v62 }
 0x61e   :  { %1771 = vmatpush3.msra.mxu1 %v147_v59 }
 0x63c   :  { %v1099_v8 = vpop.xlane.xlu1 %1098 }
 0x640   :  { %v1110_v63 = vpop.permute.xlu1 %1109  ;;  %v1090_v0 = vpop.xlane.xlu0 %1089 }
 0x641   :  { %v1092_v1 = vsub.f32 %v1082_v53, %v1090_v0  ;;  %1782 = vmatprep.subr.mxu1 %v1110_v63  ;;  %v1436_v53 = vld [vmem:[%s2276_s10 + $0x48] sm:$0xff] }
 0x643   :  { %v1095_v3 = vmul.f32 1.442695, %v1092_v1  ;;  %v1625_v1 = vld [vmem:[%s2272_s6] ss:$0 sm:$0xff] }
 0x645   :  { %1880 = vpow2.f32 %v1095_v3 }
 0x646   :  { %1882 = vrcp.f32 %v1099_v8 }
 0x652   :  { %v1881_v4 = vpop.eup %1880 }
 0x653   :  { %v1100_v6 = vsel %vm239_vm2, %v1881_v4, 0.0  ;;  %v1883_v7 = vpop.eup %1882 }
 0x654   :  { %1101 = vadd.xlane.f32.xlu0 %v1100_v6  ;;  %v1105_v13 = vmul.f32 %v1883_v7, %v1875_v52  ;;  %v1437_v52 = vld [vmem:[%s2276_s10 + $0x50] sm:$0xff] }
 0x66a   :  { %1107 = vrot.lane.b32.xlu0 %v2036_v10, %s1926_s25  ;;  %v148_v10 = vld [vmem:[%s2270_s4 + $0x18] sm:$0xff] }
 0x6dd   :  { %v1769_v9 = vpop.f32.mrf.mxu1  ;;  %v1102_v11 = vpop.xlane.xlu0 %1101 }
 0x6de   :  { %1884 = vrcp.f32 %v1102_v11 }
 0x6df   :  { %v902_v12 = vpop.f32.mrf.mxu1 }
 0x6e0   :  { %1772 = vmatprep.mubr.msk.f32.mxu1 %vm155_vm1, %v902_v12 }
 0x6e1   :  { %1773 = vmatmul.mubr.msk.f32.vlgmr.msra.gmra.mxu1 %vm155_vm1, %v1769_v9  ;;  %v1108_v14 = vpop.permute.xlu0 %1107  ;;  %v1626_v9 = vld [vmem:[%s2273_s7] ss:$0 sm:$0xff] }
 0x6e2   :  { %1783 = vmatpush3.msra.mxu1 %v1110_v63  ;;  %1786 = vmatprep.mubr.msk.f32.mxu1 %vm239_vm2, %v1105_v13  ;;  %v1430_v13 = vld [vmem:[%s2276_s10 + $0x18] sm:$0xff] }
 0x6e3   :  { %1784 = vmatprep.subr.mxu1 %v1108_v14 }
 0x6e4   :  { %1785 = vmatpush3.msra.mxu1 %v1108_v14  ;;  %v1429_v14 = vld [vmem:[%s2276_s10 + $0x10] sm:$0xff] }
 0x6e5   :  { %1789 = vmatprep.subr.mxu1 %v148_v10 }
 0x6eb   :  { %v1885_v15 = vpop.eup %1884 }
 0x6ec   :  { %v1106_v16 = vmul.f32 %v1885_v15, %v1881_v4  ;;  %v1428_v15 = vld [vmem:[%s2276_s10 + $0x8] sm:$0xff] }
 0x6ee   :  { %1787 = vmatmul.mubr.msk.f32.vlgmr.msra.gmra.mxu1 %vm239_vm2, %v1106_v16  ;;  %v1427_v16 = vld [vmem:[%s2276_s10] sm:$0xff] }
 0x6ef   :  { %1790 = vmatpush3.msra.mxu1 %v148_v10  ;;  %v1627_v10 = vld [vmem:[%s2275_s9] ss:$0 sm:$0xff] }
 0x6f0   :  { %1805 = vmatprep.subr.mxu1 %v1442_v48 }
 0x7a1   :  { %v1774_v18 = vpop.f32.mrf.mxu1 }
 0x7a2   :  { %v993_v20 = vadd.f32 %v1774_v18, %v2122_v26 }
 0x7a3   :  { %v983_v21 = vpop.f32.mrf.mxu1 }
 0x7a4   :  { %v992_v22 = vadd.f32 %v983_v21, %v2124_v28 }
 0x7ae   :  { %v1788_v23 = vpop.f32.mrf.mxu1 }
 0x7b0   :  { %v1185_v24 = vpop.f32.mrf.mxu1 }
 0x7b1   :  { %1791 = vmatprep.mubr.msk.f32.mxu1 %vm155_vm1, %v1185_v24 }
 0x7b2   :  { %1792 = vmatmul.mubr.msk.f32.vlgmr.msra.gmra.mxu1 %vm155_vm1, %v1788_v23 }
 0x7b3   :  { %1806 = vmatpush3.msra.mxu1 %v1442_v48 }
 0x7b4   :  { %1807 = vmatprep.subr.mxu1 %v1441_v19 }
 0x7b5   :  { %1808 = vmatpush3.msra.mxu1 %v1441_v19  ;;  %v1631_v19 = vld [vmem:[%s2278_s12] ss:$0 sm:$0xff] }
 0x7b6   :  { %1809 = vmatprep.subr.mxu1 %v1440_v49 }
 0x7b7   :  { %1810 = vmatpush3.msra.mxu1 %v1440_v49 }
 0x7b8   :  { %1811 = vmatprep.subr.mxu1 %v1439_v50 }
 0x7b9   :  { %1812 = vmatpush3.msra.mxu1 %v1439_v50 }
 0x7ba   :  { %1813 = vmatprep.subr.mxu1 %v1438_v51 }
 0x7bb   :  { %1814 = vmatpush3.msra.mxu1 %v1438_v51  ;;  %v1632_v51 = vld [vmem:[%s2279_s13] ss:$0 sm:$0xff] }
 0x7bc   :  { %1815 = vmatprep.subr.mxu1 %v1437_v52 }
 0x7bd   :  { %1816 = vmatpush3.msra.mxu1 %v1437_v52 }
 0x7be   :  { %1817 = vmatprep.subr.mxu1 %v1436_v53 }
 0x7bf   :  { %1818 = vmatpush3.msra.mxu1 %v1436_v53 }
 0x7c0   :  { %1819 = vmatprep.subr.mxu1 %v1435_v54 }
 0x7c1   :  { %1820 = vmatpush3.msra.mxu1 %v1435_v54 }
 0x7c2   :  { %1821 = vmatprep.subr.mxu1 %v1434_v55 }
 0x7c3   :  { %1822 = vmatpush3.msra.mxu1 %v1434_v55 }
 0x7c4   :  { %1823 = vmatprep.subr.mxu1 %v1433_v56 }
 0x7c5   :  { %1824 = vmatpush3.msra.mxu1 %v1433_v56 }
 0x7c6   :  { %1825 = vmatprep.subr.mxu1 %v1432_v57 }
 0x7c7   :  { %1826 = vmatpush3.msra.mxu1 %v1432_v57 }
 0x7c8   :  { %1827 = vmatprep.subr.mxu1 %v1431_v58 }
 0x7c9   :  { %1828 = vmatpush3.msra.mxu1 %v1431_v58 }
 0x7ca   :  { %1829 = vmatprep.subr.mxu1 %v1430_v13 }
 0x7cb   :  { %1830 = vmatpush3.msra.mxu1 %v1430_v13 }
 0x7cc   :  { %1831 = vmatprep.subr.mxu1 %v1429_v14 }
 0x7cd   :  { %1832 = vmatpush3.msra.mxu1 %v1429_v14 }
 0x7ce   :  { %1833 = vmatprep.subr.mxu1 %v1428_v15 }
 0x7cf   :  { %1834 = vmatpush3.msra.mxu1 %v1428_v15 }
 0x7d0   :  { %1835 = vmatprep.subr.mxu1 %v1427_v16 }
 0x7d1   :  { %1836 = vmatpush3.msra.mxu1 %v1427_v16 }
 0x872   :  { %v1793_v25 = vpop.f32.mrf.mxu1 }
 0x873   :  { %v1276_v29 = vadd.f32 %v1793_v25, %v993_v20  ;;  %v1630_v25 = vld [vmem:[%s2277_s11] ss:$0 sm:$0xff] }
 0x874   :  { %v1266_v30 = vpop.f32.mrf.mxu1 }
 0x875   :  { %v1285_v31 = vadd.f32 %v1624_v27, %v1276_v29  ;;  %v1275_v32 = vadd.f32 %v1266_v30, %v992_v22 }
 0x877   :  { %v1284_v33 = vadd.f32 %v1624_v27, %v1275_v32  ;;  %v1287_v26 = vadd.f32 %v1285_v31, %v2027_v5 }
 0x879   :  { %v1291_v28 = vsel %vm63_vm0, %v1287_v26, 0.0  ;;  %v1286_v34 = vadd.f32 %v1284_v33, %v2014_v2 }
 0x87a   :  { %1292 = vadd.xlane.f32.xlu0 %v1291_v28 }
 0x87b   :  { %v1288_v35 = vsel %vm63_vm0, %v1286_v34, 0.0 }
 0x87c   :  { %1289 = vadd.xlane.f32.xlu1 %v1288_v35 }
 0x903   :  { %v1293_v36 = vpop.xlane.xlu0 %1292 }
 0x904   :  { %v1296_v37 = vmul.f32 0.03125, %v1293_v36 }
 0x905   :  { %v1290_v38 = vpop.xlane.xlu1 %1289 }
 0x906   :  { %v2165_v39 = vsub.f32 %v1287_v26, %v1296_v37  ;;  %v1295_v40 = vmul.f32 0.03125, %v1290_v38 }
 0x908   :  { %v2167_v41 = vsub.f32 %v1286_v34, %v1295_v40  ;;  %v1300_v42 = vmul.f32 %v2165_v39, %v2165_v39 }
 0x90a   :  { %v1304_v5 = vsel %vm63_vm0, %v1300_v42, 0.0  ;;  %v1299_v2 = vmul.f32 %v2167_v41, %v2167_v41 }
 0x90b   :  { %1305 = vadd.xlane.f32.xlu0 %v1304_v5 }
 0x90c   :  { %v1301_v43 = vsel %vm63_vm0, %v1299_v2, 0.0 }
 0x90d   :  { %1302 = vadd.xlane.f32.xlu1 %v1301_v43 }
 0x994   :  { %v1306_v59 = vpop.xlane.xlu0 %1305 }
 0x995   :  { %v1308_v17 = vmul.f32 0.03125, %v1306_v59 }
 0x996   :  { %v1303_v60 = vpop.xlane.xlu1 %1302 }
 0x997   :  { %v1310_v61 = vadd.f32 1e-05, %v1308_v17  ;;  %v1307_v62 = vmul.f32 0.03125, %v1303_v60 }
 0x999   :  { %1886 = vrsqrt.f32 %v1310_v61  ;;  %v1309_v8 = vadd.f32 1e-05, %v1307_v62 }
 0x99b   :  { %1888 = vrsqrt.f32 %v1309_v8 }
 0x9a6   :  { %v1887_v63 = vpop.eup %1886 }
 0x9a7   :  { %v1314_v0 = vmul.f32 %v1887_v63, %v2165_v39 }
 0x9a8   :  { %v1889_v3 = vpop.eup %1888 }
 0x9a9   :  { %v1313_v4 = vmul.f32 %v1889_v3, %v2167_v41  ;;  %v1323_v6 = vmul.f32 %v1625_v1, %v1314_v0 }
 0x9ab   :  { %v1322_v7 = vmul.f32 %v1625_v1, %v1313_v4  ;;  %v1332_v12 = vadd.f32 %v1626_v9, %v1323_v6 }
 0x9ad   :  { %v1331_v11 = vadd.f32 %v1626_v9, %v1322_v7 }
 0x9af   :  { %1802 = vmatprep.mubr.msk.f32.mxu0 %vm63_vm0, %v1331_v11 }
 0x9b0   :  { %1803 = vmatmul.mubr.msk.f32.vlgmr.msra.gmra.mxu0 %vm63_vm0, %v1332_v12 }
 0xa70   :  { %v1804_v18 = vpop.f32.mrf.mxu0 }
 0xa71   :  { %v1422_v20 = vadd.f32 %v1804_v18, %v1627_v10 }
 0xa72   :  { %v1416_v21 = vpop.f32.mrf.mxu0 }
 0xa73   :  { %v1417_v22 = vadd.f32 %v1627_v10, %v1416_v21  ;;  %v1426_v24 = vmax.f32 %v1422_v20, 0.0 }
 0xa75   :  { %v1425_v23 = vmax.f32 %v1417_v22, 0.0 }
 0xa77   :  { %1837 = vmatprep.mubr.f32.mxu1 %v1425_v23 }
 0xa78   :  { %1838 = vmatmul.mubr.f32.vlgmr.msra.gmra.mxu1 %v1426_v24 }
 0xb38   :  { %v1839_v27 = vpop.f32.mrf.mxu1 }
 0xb39   :  { %v1522_v29 = vadd.f32 %v1839_v27, %v1630_v25 }
 0xb3a   :  { %v1516_v30 = vpop.f32.mrf.mxu1 }
 0xb3b   :  { %v1517_v31 = vadd.f32 %v1630_v25, %v1516_v30  ;;  %v1526_v32 = vadd.f32 %v1522_v29, %v1332_v12 }
 0xb3d   :  { %v1530_v33 = vsel %vm63_vm0, %v1526_v32, 0.0  ;;  %v1525_v26 = vadd.f32 %v1517_v31, %v1331_v11 }
 0xb3e   :  { %1531 = vadd.xlane.f32.xlu0 %v1530_v33 }
 0xb3f   :  { %v1527_v28 = vsel %vm63_vm0, %v1525_v26, 0.0 }
 0xb40   :  { %1528 = vadd.xlane.f32.xlu1 %v1527_v28 }
 0xbc7   :  { %v1532_v34 = vpop.xlane.xlu0 %1531 }
 0xbc8   :  { %v1534_v35 = vmul.f32 0.03125, %v1532_v34 }
 0xbc9   :  { %v1529_v36 = vpop.xlane.xlu1 %1528 }
 0xbca   :  { %v1536_v37 = vsub.f32 %v1526_v32, %v1534_v35  ;;  %v1533_v38 = vmul.f32 0.03125, %v1529_v36 }
 0xbcc   :  { %v1535_v39 = vsub.f32 %v1525_v26, %v1533_v38  ;;  %v1538_v40 = vmul.f32 %v1536_v37, %v1536_v37 }
 0xbce   :  { %v1542_v41 = vsel %vm63_vm0, %v1538_v40, 0.0  ;;  %v1537_v42 = vmul.f32 %v1535_v39, %v1535_v39 }
 0xbcf   :  { %1543 = vadd.xlane.f32.xlu0 %v1542_v41 }
 0xbd0   :  { %v1539_v5 = vsel %vm63_vm0, %v1537_v42, 0.0 }
 0xbd1   :  { %1540 = vadd.xlane.f32.xlu1 %v1539_v5 }
 0xc58   :  { %v1544_v2 = vpop.xlane.xlu0 %1543 }
 0xc59   :  { %v1546_v43 = vmul.f32 0.03125, %v1544_v2 }
 0xc5a   :  { %v1541_v44 = vpop.xlane.xlu1 %1540 }
 0xc5b   :  { %v1548_v45 = vadd.f32 1e-05, %v1546_v43  ;;  %v1545_v46 = vmul.f32 0.03125, %v1541_v44 }
 0xc5d   :  { %1890 = vrsqrt.f32 %v1548_v45  ;;  %v1547_v47 = vadd.f32 1e-05, %v1545_v46 }
 0xc5f   :  { %1892 = vrsqrt.f32 %v1547_v47 }
 0xc6a   :  { %v1891_v48 = vpop.eup %1890 }
 0xc6b   :  { %v1552_v49 = vmul.f32 %v1891_v48, %v1536_v37 }
 0xc6c   :  { %v1893_v50 = vpop.eup %1892 }
 0xc6d   :  { %v1551_v52 = vmul.f32 %v1893_v50, %v1535_v39  ;;  %v1561_v53 = vmul.f32 %v1631_v19, %v1552_v49 }
 0xc6f   :  { %v1560_v54 = vmul.f32 %v1631_v19, %v1551_v52  ;;  %v1570_v55 = vadd.f32 %v1632_v51, %v1561_v53 }
 0xc71   :  { %v1569_v56 = vadd.f32 %v1632_v51, %v1560_v54  ;;  %1572 = vst.msk [vmem:[#allocation2 + $0x8] sm:$0xff] %vm63_vm0, %v1570_v55 }
 0xc73   :  { %1571 = vst.msk [vmem:[#allocation2] sm:$0xff] %vm63_vm0, %v1569_v56 }
 0xc74   :  { %1905 = shalt.err (!%p1902_p4)
}
 0xc75   :  { %s1928_s12 = smov 128   ;;  %s1929_s13 = smov 8  }
 0xc76   :  { %1584 = dma.vmem_to_hbm [thread:$0]  %s1579_s29, 256, %s2280_s14, [#allocation3], %s1928_s12, %s1928_s12, %s1929_s13  }
 0xc77   :  { %1914 = dma.done.wait [#allocation3], 256  }
 0xc78   :  { %1915 = vsyncadd [#allocation3], 4294967040 }
 0xc79   :  { %1588 = vsyncpa [#allocation3], 1 }

</bundles_post_ra>
